<compile_context>
chip_gen: v7x
topology: tpu7x:2x2x1
jax: 0.10.0
libtpu: 0.0.40
codegen_flags: <defaults>
</compile_context>

<pallas_src>
import jax
import jax.numpy as jnp
import numpy as np
from jax.experimental import pallas as pl
from jax.experimental.pallas import tpu as pltpu


def _banded_weight(w_kh, W):
    """Banded matrix B of shape (W*Cin, W*Cout) with the SAME W-halo folded in:
    B[w'*Cin+cin, w*Cout+cout] = w_kh[w'-w+P, cin, cout] if 0 <= w'-w+P < K
    else 0 (edge truncation == zero padding in W).
    w_kh: (K, Cin, Cout) -- the kw/cin/cout slice of an HWIO conv weight."""
    K, Cin, Cout = w_kh.shape
    P = K // 2
    wp = jnp.arange(W)[:, None]                         # input column w'
    w = jnp.arange(W)[None, :]                          # output column w
    kw = wp - w + P                                     # (W, W)
    valid = (kw >= 0) & (kw < K)
    gathered = w_kh[jnp.clip(kw, 0, K - 1)]             # (W, W, Cin, Cout)
    B = jnp.where(valid[:, :, None, None], gathered, 0.0)
    B = jnp.transpose(B, (0, 2, 1, 3))                  # (W', Cin, W, Cout)
    return B.reshape(W * Cin, W * Cout)


def _blockdiag_weight(ws, W):
    """1x1 conv (no bias) as a block-diagonal (W*Cin, W*Cout) matrix."""
    Cin, Cout = ws.shape
    eye = jnp.eye(W, dtype=ws.dtype)
    B = eye[:, None, :, None] * ws[None, :, None, :]    # (W, Cin, W, Cout)
    return B.reshape(W * Cin, W * Cout)


def preprocess_params(w1, b1, w2, b2, ws, W, weight_dtype=jnp.bfloat16):
    """One-time weight preprocessing (hoisted out of the per-call forward):
    band the KxK convs (W-halo folded), block-diagonalize the 1x1 shortcut,
    tile biases along W, and cast the big matrices to bf16 for the MXU."""
    K1 = w1.shape[0]
    K2 = w2.shape[0]
    B1 = jnp.stack([_banded_weight(w1[kh], W) for kh in range(K1)])
    B2 = jnp.stack([_banded_weight(w2[kh], W) for kh in range(K2)])
    Bs = _blockdiag_weight(ws, W)
    b1t = jnp.tile(b1, W)[None, :].astype(jnp.float32)   # (1, W*C1)
    b2t = jnp.tile(b2, W)[None, :].astype(jnp.float32)   # (1, W*C2)
    return (B1.astype(weight_dtype), b1t,
            B2.astype(weight_dtype), b2t, Bs.astype(weight_dtype))


def _make_resblock_kernel(H, K1, K2):
    P1, P2 = K1 // 2, K2 // 2

    def conv_taps(a, B_ref, K, P):
        """K banded matmuls over H-shifted taps of the lane-dense slab `a`.
        a: (M, L) f32; B_ref: (K, L, Lout) bf16.  Returns (M, Lout) f32."""
        M = a.shape[0]
        Lout = B_ref.shape[2]
        # h index of every row inside its image; used to zero rows whose roll
        # wrapped across an image boundary (or out of the padded halo).
        row_h = jax.lax.broadcasted_iota(jnp.int32, a.shape, 0) % H
        acc = jnp.zeros((M, Lout), jnp.float32)
        for kh in range(K):
            d = kh - P                                   # input-row offset
            if d == 0:
                tap = a
            else:
                rolled = pltpu.roll(a, shift=(-d) % M, axis=0)
                if d < 0:
                    mask = row_h >= -d                   # top |d| rows -> 0
                else:
                    mask = row_h < H - d                 # bottom d rows -> 0
                tap = jnp.where(mask, rolled, 0.0)
            acc = acc + jnp.dot(tap.astype(jnp.bfloat16), B_ref[kh],
                                preferred_element_type=jnp.float32)
        return acc

    def kernel(x_ref, B1_ref, b1_ref, B2_ref, b2_ref, Bs_ref, out_ref):
        # x_ref  : (M, W*Cin)         lane-dense input slab, (W, Cin) on lanes
        # B1_ref : (K1, W*Cin, W*C1)  banded conv1 weights (bf16, W-halo folded)
        # b1_ref : (1, W*C1)          conv1 bias tiled along W
        # B2_ref : (K2, W*C1, W*C2)   banded conv2 weights (bf16)
        # b2_ref : (1, W*C2)          conv2 bias tiled along W
        # Bs_ref : (W*Cin, W*C2)      block-diagonal 1x1 shortcut weights (bf16)
        # out_ref: (M, W*C2)          lane-dense output slab (unmasked stores)
        x = x_ref[...]

        # conv1 + bias + ReLU (inter-conv activation)
        h1 = jnp.maximum(conv_taps(x, B1_ref, K1, P1) + b1_ref[...], 0.0)

        # conv2 + bias (last conv: no activation inside main path)
        main = conv_taps(h1, B2_ref, K2, P2) + b2_ref[...]

        # 1x1 shortcut, no bias
        shortcut = jnp.dot(x.astype(jnp.bfloat16), Bs_ref[...],
                           preferred_element_type=jnp.float32)

        # residual add + final ReLU; full-lane unmasked store
        out_ref[...] = jnp.maximum(main + shortcut, 0.0).astype(out_ref.dtype)

    return kernel


@jax.jit
def residual_block_forward(x_nchw, B1, b1t, B2, b2t, Bs):
    """x_nchw: (N, Cin, H, W) float32.  B*/b*t come from preprocess_params."""
    N, Cin, H, W = x_nchw.shape
    K1, K2 = B1.shape[0], B2.shape[0]
    C1 = b1t.shape[1] // W
    C2 = b2t.shape[1] // W
    M = N * H

    # Layout plumbing only (plain XLA, tiny): (W, Cin) fused onto lanes.
    x = jnp.transpose(x_nchw, (0, 2, 3, 1)).reshape(M, W * Cin)

    kernel = _make_resblock_kernel(H, K1, K2)

    flops = 2 * M * (K1 * (W * Cin) * (W * C1)
                     + K2 * (W * C1) * (W * C2)
                     + (W * Cin) * (W * C2))
    bytes_accessed = (x.size * 4
                      + B1.size * B1.dtype.itemsize
                      + B2.size * B2.dtype.itemsize
                      + Bs.size * Bs.dtype.itemsize
                      + b1t.size * 4 + b2t.size * 4
                      + M * (W * C2) * 4)

    out_flat = pl.pallas_call(
        kernel,
        out_shape=jax.ShapeDtypeStruct((M, W * C2), jnp.float32),
        grid_spec=pltpu.PrefetchScalarGridSpec(
            num_scalar_prefetch=0,
            grid=(1,),   # whole batch in one block: amortize per-step overhead
            in_specs=[
                pl.BlockSpec((M, W * Cin), lambda n: (0, 0)),
                pl.BlockSpec((K1, W * Cin, W * C1), lambda n: (0, 0, 0)),
                pl.BlockSpec((1, W * C1), lambda n: (0, 0)),
                pl.BlockSpec((K2, W * C1, W * C2), lambda n: (0, 0, 0)),
                pl.BlockSpec((1, W * C2), lambda n: (0, 0)),
                pl.BlockSpec((W * Cin, W * C2), lambda n: (0, 0)),
            ],
            out_specs=pl.BlockSpec((M, W * C2), lambda n: (0, 0)),
        ),
        compiler_params=pltpu.CompilerParams(
            dimension_semantics=("arbitrary",)),
        cost_estimate=pl.CostEstimate(flops=flops, transcendentals=0,
                                      bytes_accessed=bytes_accessed),
    )(x, B1, b1t, B2, b2t, Bs)

    out = out_flat.reshape(N, H, W, C2)
    return jnp.transpose(out, (0, 3, 1, 2))              # NHWC -> NCHW


def reference_forward(x_nchw, w1, b1, w2, b2, ws):
    """Pure-JAX f32 reference (same math as the PyTorch module)."""
    x = jnp.transpose(x_nchw, (0, 2, 3, 1))
    dn = ('NHWC', 'HWIO', 'NHWC')
    h = jax.lax.conv_general_dilated(x, w1, (1, 1), 'SAME',
                                     dimension_numbers=dn) + b1
    h = jnp.maximum(h, 0.0)
    main = jax.lax.conv_general_dilated(h, w2, (1, 1), 'SAME',
                                        dimension_numbers=dn) + b2
    shortcut = jnp.einsum('nhwc,cd->nhwd', x, ws)
    out = jnp.maximum(main + shortcut, 0.0)
    return jnp.transpose(out, (0, 3, 1, 2))


if __name__ == "__main__":
    # ResidualBlock(in_channels=4, channels=[8, 8], kernel_sizes=[3, 3])
    N, Cin, H, W = 2, 4, 16, 16
    C1, C2 = 8, 8
    K1, K2 = 3, 3

    key = jax.random.PRNGKey(0)
    kx, kw1, kb1, kw2, kb2, kws = jax.random.split(key, 6)

    x = jax.random.normal(kx, (N, Cin, H, W), jnp.float32)
    # Deterministic synthetic parameters (HWIO layout), small scale.
    w1 = 0.1 * jax.random.normal(kw1, (K1, K1, Cin, C1), jnp.float32)
    b1 = 0.1 * jax.random.normal(kb1, (C1,), jnp.float32)
    w2 = 0.1 * jax.random.normal(kw2, (K2, K2, C1, C2), jnp.float32)
    b2 = 0.1 * jax.random.normal(kb2, (C2,), jnp.float32)
    ws = 0.1 * jax.random.normal(kws, (Cin, C2), jnp.float32)  # 1x1 shortcut

    # One-time weight preprocessing (NOT inside the per-call forward).
    params = preprocess_params(w1, b1, w2, b2, ws, W)
    B1, b1t, B2, b2t, Bs = jax.block_until_ready(params)

    out = residual_block_forward(x, B1, b1t, B2, b2t, Bs)
    out = jax.block_until_ready(out)

    ref = reference_forward(x, w1, b1, w2, b2, ws)
    # bf16 matmul inputs with f32 accumulation -> relaxed tolerance vs f32 ref.
    np.testing.assert_allclose(np.asarray(out), np.asarray(ref),
                               rtol=2e-2, atol=2e-2)

    print("KERNEL_OK")
</pallas_src>

<mosaic_0001>
module attributes {stable_mosaic.version = 11 : i64} {
  func.func @kernel(%arg0: i32, %arg1: memref<32x64xf32, #tpu.memory_space<vmem>>, %arg2: memref<3x64x128xbf16, #tpu.memory_space<vmem>>, %arg3: memref<1x128xf32, #tpu.memory_space<vmem>>, %arg4: memref<3x128x128xbf16, #tpu.memory_space<vmem>>, %arg5: memref<1x128xf32, #tpu.memory_space<vmem>>, %arg6: memref<64x128xbf16, #tpu.memory_space<vmem>>, %arg7: memref<32x128xf32, #tpu.memory_space<vmem>>) attributes {dimension_semantics = [#tpu.dimension_semantics<arbitrary>], iteration_bounds = array<i64: 1>, scalar_prefetch = 0 : i64, scratch_operands = 0 : i64, tpu.core_type = #tpu.core_type<tc>, window_params = [{pipeline_mode = #tpu.pipeline_mode<synchronous>, transform_indices = @transform_0, window_bounds = array<i64: 32, 64>}, {pipeline_mode = #tpu.pipeline_mode<synchronous>, transform_indices = @transform_1, window_bounds = array<i64: 3, 64, 128>}, {pipeline_mode = #tpu.pipeline_mode<synchronous>, transform_indices = @transform_2, window_bounds = array<i64: 1, 128>}, {pipeline_mode = #tpu.pipeline_mode<synchronous>, transform_indices = @transform_3, window_bounds = array<i64: 3, 128, 128>}, {pipeline_mode = #tpu.pipeline_mode<synchronous>, transform_indices = @transform_4, window_bounds = array<i64: 1, 128>}, {pipeline_mode = #tpu.pipeline_mode<synchronous>, transform_indices = @transform_5, window_bounds = array<i64: 64, 128>}, {pipeline_mode = #tpu.pipeline_mode<synchronous>, transform_indices = @transform_6, window_bounds = array<i64: 32, 128>}]} {
    %c0 = arith.constant 0 : index
    %c0_0 = arith.constant 0 : index
    %0 = vector.load %arg1[%c0, %c0_0] : memref<32x64xf32, #tpu.memory_space<vmem>>, vector<32x64xf32>
    %1 = tpu.iota {dimensions = array<i32: 0>} : vector<32x64xi32>
    %c16_i32 = arith.constant 16 : i32
    %c0_i32 = arith.constant 0 : i32
    %2 = arith.cmpi eq, %c16_i32, %c0_i32 : i32
    %c1_i32 = arith.constant 1 : i32
    %3 = arith.select %2, %c1_i32, %c16_i32 : i32
    %4 = vector.broadcast %3 : i32 to vector<32x64xi32>
    %5 = arith.remsi %1, %4 : vector<32x64xi32>
    %c0_i32_1 = arith.constant 0 : i32
    %6 = vector.broadcast %c0_i32_1 : i32 to vector<32x64xi32>
    %7 = arith.cmpi ne, %5, %6 : vector<32x64xi32>
    %c0_i32_2 = arith.constant 0 : i32
    %8 = vector.broadcast %c0_i32_2 : i32 to vector<32x64xi32>
    %9 = arith.cmpi slt, %5, %8 : vector<32x64xi32>
    %c0_i32_3 = arith.constant 0 : i32
    %10 = arith.cmpi slt, %3, %c0_i32_3 : i32
    %11 = vector.broadcast %10 : i1 to vector<32x64xi1>
    %12 = vector.broadcast %11 : vector<32x64xi1> to vector<32x64xi1>
    %13 = arith.xori %9, %12 : vector<32x64xi1>
    %14 = arith.andi %13, %7 : vector<32x64xi1>
    %15 = vector.broadcast %3 : i32 to vector<32x64xi32>
    %16 = arith.addi %5, %15 : vector<32x64xi32>
    %17 = arith.select %14, %16, %5 : vector<32x64xi1>, vector<32x64xi32>
    %cst = arith.constant 0.000000e+00 : f32
    %18 = vector.broadcast %cst : f32 to vector<32x128xf32>
    %c1_i32_4 = arith.constant 1 : i32
    %19 = tpu.dynamic_rotate %0 by %c1_i32_4 dim 0 : vector<32x64xf32>, i32 -> vector<32x64xf32>
    %c1_i32_5 = arith.constant 1 : i32
    %20 = vector.broadcast %c1_i32_5 : i32 to vector<32x64xi32>
    %21 = arith.cmpi sge, %17, %20 : vector<32x64xi32>
    %cst_6 = arith.constant 0.000000e+00 : f32
    %22 = vector.broadcast %cst_6 : f32 to vector<32x64xf32>
    %23 = arith.select %21, %19, %22 : vector<32x64xi1>, vector<32x64xf32>
    %24 = arith.truncf %23 : vector<32x64xf32> to vector<32x64xbf16>
    %c0_7 = arith.constant 0 : index
    %c0_8 = arith.constant 0 : index
    %c0_9 = arith.constant 0 : index
    %25 = vector.load %arg2[%c0_7, %c0_8, %c0_9] : memref<3x64x128xbf16, #tpu.memory_space<vmem>>, vector<1x64x128xbf16>
    %26 = vector.shape_cast %25 : vector<1x64x128xbf16> to vector<64x128xbf16>
    %cst_10 = arith.constant dense<0.000000e+00> : vector<32x128xf32>
    %27 = tpu.matmul %24, %26, %cst_10 {dimension_numbers = #tpu.dot_dimension_numbers<[1], [0], [0], [1], [0, 0, 1, 1], [], []>} : vector<32x64xbf16>, vector<64x128xbf16>, vector<32x128xf32> -> vector<32x128xf32>
    %28 = arith.addf %18, %27 : vector<32x128xf32>
    %29 = arith.truncf %0 : vector<32x64xf32> to vector<32x64xbf16>
    %c1 = arith.constant 1 : index
    %c0_11 = arith.constant 0 : index
    %c0_12 = arith.constant 0 : index
    %30 = vector.load %arg2[%c1, %c0_11, %c0_12] : memref<3x64x128xbf16, #tpu.memory_space<vmem>>, vector<1x64x128xbf16>
    %31 = vector.shape_cast %30 : vector<1x64x128xbf16> to vector<64x128xbf16>
    %cst_13 = arith.constant dense<0.000000e+00> : vector<32x128xf32>
    %32 = tpu.matmul %29, %31, %cst_13 {dimension_numbers = #tpu.dot_dimension_numbers<[1], [0], [0], [1], [0, 0, 1, 1], [], []>} : vector<32x64xbf16>, vector<64x128xbf16>, vector<32x128xf32> -> vector<32x128xf32>
    %33 = arith.addf %28, %32 : vector<32x128xf32>
    %c31_i32 = arith.constant 31 : i32
    %34 = tpu.dynamic_rotate %0 by %c31_i32 dim 0 : vector<32x64xf32>, i32 -> vector<32x64xf32>
    %c15_i32 = arith.constant 15 : i32
    %35 = vector.broadcast %c15_i32 : i32 to vector<32x64xi32>
    %36 = arith.cmpi slt, %17, %35 : vector<32x64xi32>
    %cst_14 = arith.constant 0.000000e+00 : f32
    %37 = vector.broadcast %cst_14 : f32 to vector<32x64xf32>
    %38 = arith.select %36, %34, %37 : vector<32x64xi1>, vector<32x64xf32>
    %39 = arith.truncf %38 : vector<32x64xf32> to vector<32x64xbf16>
    %c2 = arith.constant 2 : index
    %c0_15 = arith.constant 0 : index
    %c0_16 = arith.constant 0 : index
    %40 = vector.load %arg2[%c2, %c0_15, %c0_16] : memref<3x64x128xbf16, #tpu.memory_space<vmem>>, vector<1x64x128xbf16>
    %41 = vector.shape_cast %40 : vector<1x64x128xbf16> to vector<64x128xbf16>
    %cst_17 = arith.constant dense<0.000000e+00> : vector<32x128xf32>
    %42 = tpu.matmul %39, %41, %cst_17 {dimension_numbers = #tpu.dot_dimension_numbers<[1], [0], [0], [1], [0, 0, 1, 1], [], []>} : vector<32x64xbf16>, vector<64x128xbf16>, vector<32x128xf32> -> vector<32x128xf32>
    %43 = arith.addf %33, %42 : vector<32x128xf32>
    %c0_18 = arith.constant 0 : index
    %c0_19 = arith.constant 0 : index
    %44 = vector.load %arg3[%c0_18, %c0_19] : memref<1x128xf32, #tpu.memory_space<vmem>>, vector<1x128xf32>
    %45 = vector.broadcast %44 : vector<1x128xf32> to vector<32x128xf32>
    %46 = arith.addf %43, %45 : vector<32x128xf32>
    %cst_20 = arith.constant 0.000000e+00 : f32
    %47 = vector.broadcast %cst_20 : f32 to vector<32x128xf32>
    %48 = arith.maximumf %46, %47 : vector<32x128xf32>
    %49 = tpu.iota {dimensions = array<i32: 0>} : vector<32x128xi32>
    %c16_i32_21 = arith.constant 16 : i32
    %c0_i32_22 = arith.constant 0 : i32
    %50 = arith.cmpi eq, %c16_i32_21, %c0_i32_22 : i32
    %c1_i32_23 = arith.constant 1 : i32
    %51 = arith.select %50, %c1_i32_23, %c16_i32_21 : i32
    %52 = vector.broadcast %51 : i32 to vector<32x128xi32>
    %53 = arith.remsi %49, %52 : vector<32x128xi32>
    %c0_i32_24 = arith.constant 0 : i32
    %54 = vector.broadcast %c0_i32_24 : i32 to vector<32x128xi32>
    %55 = arith.cmpi ne, %53, %54 : vector<32x128xi32>
    %c0_i32_25 = arith.constant 0 : i32
    %56 = vector.broadcast %c0_i32_25 : i32 to vector<32x128xi32>
    %57 = arith.cmpi slt, %53, %56 : vector<32x128xi32>
    %c0_i32_26 = arith.constant 0 : i32
    %58 = arith.cmpi slt, %51, %c0_i32_26 : i32
    %59 = vector.broadcast %58 : i1 to vector<32x128xi1>
    %60 = vector.broadcast %59 : vector<32x128xi1> to vector<32x128xi1>
    %61 = arith.xori %57, %60 : vector<32x128xi1>
    %62 = arith.andi %61, %55 : vector<32x128xi1>
    %63 = vector.broadcast %51 : i32 to vector<32x128xi32>
    %64 = arith.addi %53, %63 : vector<32x128xi32>
    %65 = arith.select %62, %64, %53 : vector<32x128xi1>, vector<32x128xi32>
    %cst_27 = arith.constant 0.000000e+00 : f32
    %66 = vector.broadcast %cst_27 : f32 to vector<32x128xf32>
    %c1_i32_28 = arith.constant 1 : i32
    %67 = tpu.dynamic_rotate %48 by %c1_i32_28 dim 0 : vector<32x128xf32>, i32 -> vector<32x128xf32>
    %c1_i32_29 = arith.constant 1 : i32
    %68 = vector.broadcast %c1_i32_29 : i32 to vector<32x128xi32>
    %69 = arith.cmpi sge, %65, %68 : vector<32x128xi32>
    %cst_30 = arith.constant 0.000000e+00 : f32
    %70 = vector.broadcast %cst_30 : f32 to vector<32x128xf32>
    %71 = arith.select %69, %67, %70 : vector<32x128xi1>, vector<32x128xf32>
    %72 = arith.truncf %71 : vector<32x128xf32> to vector<32x128xbf16>
    %c0_31 = arith.constant 0 : index
    %c0_32 = arith.constant 0 : index
    %c0_33 = arith.constant 0 : index
    %73 = vector.load %arg4[%c0_31, %c0_32, %c0_33] : memref<3x128x128xbf16, #tpu.memory_space<vmem>>, vector<1x128x128xbf16>
    %74 = vector.shape_cast %73 : vector<1x128x128xbf16> to vector<128x128xbf16>
    %cst_34 = arith.constant dense<0.000000e+00> : vector<32x128xf32>
    %75 = tpu.matmul %72, %74, %cst_34 {dimension_numbers = #tpu.dot_dimension_numbers<[1], [0], [0], [1], [0, 0, 1, 1], [], []>} : vector<32x128xbf16>, vector<128x128xbf16>, vector<32x128xf32> -> vector<32x128xf32>
    %76 = arith.addf %66, %75 : vector<32x128xf32>
    %77 = arith.truncf %48 : vector<32x128xf32> to vector<32x128xbf16>
    %c1_35 = arith.constant 1 : index
    %c0_36 = arith.constant 0 : index
    %c0_37 = arith.constant 0 : index
    %78 = vector.load %arg4[%c1_35, %c0_36, %c0_37] : memref<3x128x128xbf16, #tpu.memory_space<vmem>>, vector<1x128x128xbf16>
    %79 = vector.shape_cast %78 : vector<1x128x128xbf16> to vector<128x128xbf16>
    %cst_38 = arith.constant dense<0.000000e+00> : vector<32x128xf32>
    %80 = tpu.matmul %77, %79, %cst_38 {dimension_numbers = #tpu.dot_dimension_numbers<[1], [0], [0], [1], [0, 0, 1, 1], [], []>} : vector<32x128xbf16>, vector<128x128xbf16>, vector<32x128xf32> -> vector<32x128xf32>
    %81 = arith.addf %76, %80 : vector<32x128xf32>
    %c31_i32_39 = arith.constant 31 : i32
    %82 = tpu.dynamic_rotate %48 by %c31_i32_39 dim 0 : vector<32x128xf32>, i32 -> vector<32x128xf32>
    %c15_i32_40 = arith.constant 15 : i32
    %83 = vector.broadcast %c15_i32_40 : i32 to vector<32x128xi32>
    %84 = arith.cmpi slt, %65, %83 : vector<32x128xi32>
    %cst_41 = arith.constant 0.000000e+00 : f32
    %85 = vector.broadcast %cst_41 : f32 to vector<32x128xf32>
    %86 = arith.select %84, %82, %85 : vector<32x128xi1>, vector<32x128xf32>
    %87 = arith.truncf %86 : vector<32x128xf32> to vector<32x128xbf16>
    %c2_42 = arith.constant 2 : index
    %c0_43 = arith.constant 0 : index
    %c0_44 = arith.constant 0 : index
    %88 = vector.load %arg4[%c2_42, %c0_43, %c0_44] : memref<3x128x128xbf16, #tpu.memory_space<vmem>>, vector<1x128x128xbf16>
    %89 = vector.shape_cast %88 : vector<1x128x128xbf16> to vector<128x128xbf16>
    %cst_45 = arith.constant dense<0.000000e+00> : vector<32x128xf32>
    %90 = tpu.matmul %87, %89, %cst_45 {dimension_numbers = #tpu.dot_dimension_numbers<[1], [0], [0], [1], [0, 0, 1, 1], [], []>} : vector<32x128xbf16>, vector<128x128xbf16>, vector<32x128xf32> -> vector<32x128xf32>
    %91 = arith.addf %81, %90 : vector<32x128xf32>
    %c0_46 = arith.constant 0 : index
    %c0_47 = arith.constant 0 : index
    %92 = vector.load %arg5[%c0_46, %c0_47] : memref<1x128xf32, #tpu.memory_space<vmem>>, vector<1x128xf32>
    %93 = vector.broadcast %92 : vector<1x128xf32> to vector<32x128xf32>
    %94 = arith.addf %91, %93 : vector<32x128xf32>
    %95 = arith.truncf %0 : vector<32x64xf32> to vector<32x64xbf16>
    %c0_48 = arith.constant 0 : index
    %c0_49 = arith.constant 0 : index
    %96 = vector.load %arg6[%c0_48, %c0_49] : memref<64x128xbf16, #tpu.memory_space<vmem>>, vector<64x128xbf16>
    %cst_50 = arith.constant dense<0.000000e+00> : vector<32x128xf32>
    %97 = tpu.matmul %95, %96, %cst_50 {dimension_numbers = #tpu.dot_dimension_numbers<[1], [0], [0], [1], [0, 0, 1, 1], [], []>} : vector<32x64xbf16>, vector<64x128xbf16>, vector<32x128xf32> -> vector<32x128xf32>
    %98 = arith.addf %94, %97 : vector<32x128xf32>
    %cst_51 = arith.constant 0.000000e+00 : f32
    %99 = vector.broadcast %cst_51 : f32 to vector<32x128xf32>
    %100 = arith.maximumf %98, %99 : vector<32x128xf32>
    %c0_52 = arith.constant 0 : index
    %c0_53 = arith.constant 0 : index
    %101 = vector.load %arg7[%c0_52, %c0_53] : memref<32x128xf32, #tpu.memory_space<vmem>>, vector<32x128xf32>
    tpu.vector_store %arg7[%c0_52, %c0_53], %100 {strides = array<i32>} : memref<32x128xf32, #tpu.memory_space<vmem>>, vector<32x128xf32>,
    return
  }
  func.func @transform_0(%arg0: i32) -> (i32, i32) {
    %c0_i32 = arith.constant 0 : i32
    %c0_i32_0 = arith.constant 0 : i32
    %c0_i32_1 = arith.constant 0 : i32
    return %c0_i32, %c0_i32_0 : i32, i32
  }
  func.func @transform_1(%arg0: i32) -> (i32, i32, i32) {
    %c0_i32 = arith.constant 0 : i32
    %c0_i32_0 = arith.constant 0 : i32
    %c0_i32_1 = arith.constant 0 : i32
    %c0_i32_2 = arith.constant 0 : i32
    return %c0_i32, %c0_i32_0, %c0_i32_1 : i32, i32, i32
  }
  func.func @transform_2(%arg0: i32) -> (i32, i32) {
    %c0_i32 = arith.constant 0 : i32
    %c0_i32_0 = arith.constant 0 : i32
    %c0_i32_1 = arith.constant 0 : i32
    return %c0_i32, %c0_i32_0 : i32, i32
  }
  func.func @transform_3(%arg0: i32) -> (i32, i32, i32) {
    %c0_i32 = arith.constant 0 : i32
    %c0_i32_0 = arith.constant 0 : i32
    %c0_i32_1 = arith.constant 0 : i32
    %c0_i32_2 = arith.constant 0 : i32
    return %c0_i32, %c0_i32_0, %c0_i32_1 : i32, i32, i32
  }
  func.func @transform_4(%arg0: i32) -> (i32, i32) {
    %c0_i32 = arith.constant 0 : i32
    %c0_i32_0 = arith.constant 0 : i32
    %c0_i32_1 = arith.constant 0 : i32
    return %c0_i32, %c0_i32_0 : i32, i32
  }
  func.func @transform_5(%arg0: i32) -> (i32, i32) {
    %c0_i32 = arith.constant 0 : i32
    %c0_i32_0 = arith.constant 0 : i32
    %c0_i32_1 = arith.constant 0 : i32
    return %c0_i32, %c0_i32_0 : i32, i32
  }
  func.func @transform_6(%arg0: i32) -> (i32, i32) {
    %c0_i32 = arith.constant 0 : i32
    %c0_i32_0 = arith.constant 0 : i32
    %c0_i32_1 = arith.constant 0 : i32
    return %c0_i32, %c0_i32_0 : i32, i32
  }
}

</mosaic_0001>

<bundles_post_ra>
// kernel: residual_block_forward.1
= control target key start
LH: loop header
LB: loop body
LE: loop exit
PB: predicated region body
PF: predicated region fallthrough
CT: control target
= control target key end

     0   :  { %v28_v0 = vlaneseq  ;;  %vm143_vm0 = vcmask 523264   ;;  %vm1224_vm7 = vmmov 1   ;;  %s1522_s1 = inlined_call_operand.vmem [shape: bf16[3,64,128], index: 1, kind: input, shape index: {}]   ;;  %s1523_s0 = inlined_call_operand.vmem [shape: f32[32,64], index: 0, kind: input, shape index: {}]   ;;  %s1524_s3 = inlined_call_operand.vmem [shape: bf16[3,128,128], index: 3, kind: input, shape index: {}]   ;;  %s1525_s5 = inlined_call_operand.vmem [shape: bf16[64,128], index: 5, kind: input, shape index: {}]   ;;  %s1526_s2 = inlined_call_operand.vmem [shape: f32[1,128], index: 2, kind: input, shape index: {}]   ;;  %s1527_s4 = inlined_call_operand.vmem [shape: f32[1,128], index: 4, kind: input, shape index: {}]   ;;  %s1528_s6 = inlined_call_operand.vmem [shape: f32[32,128], index: 6, kind: output, shape index: {}]  }
   0x1   :  { %v1184_v1 = vld [vmem:[%s1522_s1 + $0x20] sm:$0xff]   ;;  %v1185_v2 = vld [vmem:[%s1522_s1 + $0x28] sm:$0xff]   ;;  %v1186_v4 = vld [vmem:[%s1522_s1 + $0x30] sm:$0xff]  }
   0x2   :  { %v1266_v3 = vshrl.u32 %v28_v0, 7  ;;  %1051 = vmatprep.subr.bf16.mxu0 %v1184_v1  ;;  %v1274_v5 = vld [vmem:[%s1523_s0] sm:$0xff]  ;;  %v1279_v6 = vld [vmem:[%s1523_s0 + $0x8] sm:$0xff]  ;;  %v1290_v10 = vld [vmem:[%s1523_s0 + $0x18] sm:$0xff] }
   0x3   :  { %1052 = vmatpush3.bf16.msra.mxu0 %v1184_v1  ;;  %v81_v7 = vrot.slane %v1274_v5, 7  ;;  %v1284_v8 = vpack.c.bf16 %v1279_v6, %v1274_v5  ;;  %v84_v11 = vrot.slane %v1290_v10, 7  ;;  %v1187_v12 = vld [vmem:[%s1522_s1 + $0x38] sm:$0xff]   ;;  %v82_v13 = vrot.slane %v1279_v6, 7  ;;  %v1309_v16 = vld [vmem:[%s1523_s0 + $0x10] sm:$0xff]  ;;  %v1188_v17 = vld [vmem:[%s1522_s1] sm:$0xff]  }
   0x4   :  { %1053 = vmatprep.subr.bf16.mxu0 %v1185_v2  ;;  %v37_v9 = vand.u32 15, %v1266_v3  ;;  %vm85_vm1 = vcmp.lt.s32.totalorder %v1266_v3, 1  ;;  %v31_v20 = vadd.s32 16, %v1266_v3  ;;  %v1321_v21 = vpack.c.bf16 %v1290_v10, %v1309_v16  ;;  %v1189_v23 = vld [vmem:[%s1522_s1 + $0x8] sm:$0xff]   ;;  %v1197_v25 = vld [vmem:[%s1524_s3] sm:$0xff]   ;;  %v1190_v32 = vld [vmem:[%s1522_s1 + $0x10] sm:$0xff]  }
   0x5   :  { %1059 = vmatprep.mubr.msk.bf16.mxu0 %vm143_vm0, %v1284_v8  ;;  %v89_v14 = vsel %vm85_vm1, %v84_v11, %v81_v7  ;;  %v88_v18 = vsel %vm85_vm1, %v81_v7, %v82_v13  ;;  %v30_v22 = vadd.s32 8, %v1266_v3  ;;  %v83_v26 = vrot.slane %v1309_v16, 7  ;;  %1107 = vmatprep.subr.bf16.mxu1 %v1197_v25  ;;  %v1199_v31 = vld [vmem:[%s1524_s3 + $0x8] sm:$0xff]   ;;  %v1201_v35 = vld [vmem:[%s1524_s3 + $0x10] sm:$0xff]   ;;  %v1191_v39 = vld [vmem:[%s1522_s1 + $0x18] sm:$0xff]  }
   0x6   :  { %vm1302_vm2 = vcmp.ge.s32.totalorder %v37_v9, 1  ;;  %v51_v27 = vand.u32 15, %v31_v20  ;;  %v279_v28 = vrot.slane %v1279_v6, 1  ;;  %v280_v29 = vrot.slane %v1309_v16, 1  ;;  %1108 = vmatpush3.bf16.msra.mxu1 %v1197_v25  ;;  %v1203_v43 = vld [vmem:[%s1524_s3 + $0x18] sm:$0xff]   ;;  %v1192_v44 = vld [vmem:[%s1522_s1 + $0x40] sm:$0xff]  }
   0x7   :  { %1054 = vmatpush3.bf16.msra.mxu0 %v1185_v2  ;;  %v94_v19 = vsel %vm1302_vm2, %v89_v14, 0.0  ;;  %v44_v30 = vand.u32 15, %v30_v22  ;;  %vm282_vm3 = vcmp.lt.s32.totalorder %v1266_v3, 7  ;;  %v87_v33 = vsel %vm85_vm1, %v82_v13, %v83_v26  ;;  %1109 = vmatprep.subr.bf16.mxu1 %v1199_v31  ;;  %v1205_v46 = vld [vmem:[%s1524_s3 + $0x20] sm:$0xff]   ;;  %v1193_v49 = vld [vmem:[%s1522_s1 + $0x48] sm:$0xff]   ;;  %v1194_v52 = vld [vmem:[%s1522_s1 + $0x50] sm:$0xff]  }
   0x8   :  { %1055 = vmatprep.subr.bf16.mxu0 %v1186_v4  ;;  %v98_v24 = vpack.c.bf16 %v88_v18, %v94_v19  ;;  %vm1345_vm4 = vcmp.ge.s32.totalorder %v51_v27, 1  ;;  %v284_v36 = vsel %vm282_vm3, %v279_v28, %v280_v29  ;;  %v278_v38 = vrot.slane %v1274_v5, 1  ;;  %v1195_v54 = vld [vmem:[%s1522_s1 + $0x58] sm:$0xff]   ;;  %v1196_v59 = vld [vmem:[%s1524_s3 + $0x40] sm:$0xff]   ;;  %v1198_v61 = vld [vmem:[%s1524_s3 + $0x48] sm:$0xff]  }
   0x9   :  { %vm1354_vm5 = vcmp.lt.s32.totalorder %v44_v30, 15  ;;  %v96_v40 = vsel %vm1345_vm4, %v87_v33, 0.0  ;;  %v32_v41 = vadd.s32 24, %v1266_v3  ;;  %v86_v45 = vsel %vm85_vm1, %v83_v26, %v84_v11  ;;  %v1200_v62 = vld [vmem:[%s1524_s3 + $0x50] sm:$0xff]   ;;  %v1202_v63 = vld [vmem:[%s1524_s3 + $0x58] sm:$0xff]   ;;  %v1204_v0 = vld [vmem:[%s1524_s3 + $0x60] sm:$0xff]  }
   0xa   :  { %1110 = vmatpush3.bf16.msra.mxu1 %v1199_v31  ;;  %v292_v42 = vsel %vm1354_vm5, %v284_v36, 0.0  ;;  %v285_v47 = vsel %vm282_vm3, %v278_v38, %v279_v28  ;;  %v99_v48 = vpack.c.bf16 %v86_v45, %v96_v40  ;;  %v281_v51 = vrot.slane %v1290_v10, 1  ;;  %v1206_v1 = vld [vmem:[%s1524_s3 + $0x68] sm:$0xff]   ;;  %v1209_v5 = vld [vmem:[%s1524_s3 + $0x30] sm:$0xff]   ;;  %v1210_v6 = vld [vmem:[%s1524_s3 + $0x78] sm:$0xff]  }
   0xb   :  { %1056 = vmatpush3.bf16.msra.mxu0 %v1186_v4  ;;  %1111 = vmatprep.subr.bf16.mxu1 %v1201_v35  ;;  %v295_v50 = vpack.c.bf16 %v292_v42, %v285_v47  ;;  %v58_v53 = vand.u32 15, %v32_v41  ;;  %v1207_v2 = vld [vmem:[%s1524_s3 + $0x28] sm:$0xff]   ;;  %v1208_v4 = vld [vmem:[%s1524_s3 + $0x70] sm:$0xff]   ;;  %v1211_v7 = vld [vmem:[%s1524_s3 + $0x38] sm:$0xff]  }
   0xc   :  { %1057 = vmatprep.subr.bf16.mxu0 %v1187_v12  ;;  %v286_v55 = vsel %vm282_vm3, %v281_v51, %v278_v38  ;;  %v283_v57 = vsel %vm282_vm3, %v280_v29, %v281_v51  ;;  %v1212_v9 = vld [vmem:[%s1524_s3 + $0x80] sm:$0xff]   ;;  %vm954_vm8 = vmpackc.low %vm1224_vm7, %vm1302_vm2  ;;  %v1214_v34 = vld [vmem:[%s1524_s3 + $0x90] sm:$0xff]  }
   0xd   :  { %vm1394_vm6 = vcmp.lt.s32.totalorder %v58_v53, 15  ;;  %v921_v10 = vld [vmem:[%s1526_s2] ss:$0 sm:$0xff]  ;;  %vm957_vm9 = vmpackc.low %vm1224_vm7, %vm1345_vm4  ;;  %v1215_v3 = vld [vmem:[%s1524_s3 + $0x98] sm:$0xff]  }
   0xe   :  { %1112 = vmatpush3.bf16.msra.mxu1 %v1201_v35  ;;  %v294_v58 = vsel %vm1394_vm6, %v286_v55, 0.0  ;;  %vm984_vm10 = vmpackc.low %vm1354_vm5, %vm1224_vm7  ;;  %v1216_v37 = vld [vmem:[%s1524_s3 + $0xa0] sm:$0xff]   ;;  %v1219_v51 = vld [vmem:[%s1524_s3 + $0xb8] sm:$0xff]  }
   0xf   :  { %1058 = vmatpush3.bf16.msra.mxu0 %v1187_v12  ;;  %1113 = vmatprep.subr.bf16.mxu1 %v1203_v43  ;;  %v296_v60 = vpack.c.bf16 %v294_v58, %v283_v57  ;;  %vm987_vm11 = vmpackc.low %vm1394_vm6, %vm1224_vm7  ;;  %v1221_v53 = vld [vmem:[%s1525_s5 + $0x8] sm:$0xff]   ;;  %v1223_v55 = vld [vmem:[%s1525_s5 + $0x18] sm:$0xff]  }
  0x10   :  { %1063 = vmatprep.subr.bf16.mxu0 %v1188_v17 }
  0x12   :  { %1060 = vmatmul.mubr.msk.bf16.vlgmr.msra.gmra.mrb[0].mxu0 %vm143_vm0, %v1321_v21  ;;  %1114 = vmatpush3.bf16.msra.mxu1 %v1203_v43 }
  0x13   :  { %1064 = vmatpush3.bf16.msra.mxu0 %v1188_v17  ;;  %1071 = vmatprep.mubr.msk.bf16.mxu0 %vm143_vm0, %v98_v24 }
  0x14   :  { %1065 = vmatprep.subr.bf16.mxu0 %v1189_v23  ;;  %1115 = vmatprep.subr.bf16.mxu1 %v1205_v46 }
  0x16   :  { %1116 = vmatpush3.bf16.msra.mxu1 %v1205_v46 }
  0x17   :  { %1066 = vmatpush3.bf16.msra.mxu0 %v1189_v23  ;;  %1117 = vmatprep.subr.bf16.mxu1 %v1207_v2 }
  0x18   :  { %1067 = vmatprep.subr.bf16.mxu0 %v1190_v32 }
  0x1a   :  { %1118 = vmatpush3.bf16.msra.mxu1 %v1207_v2 }
  0x1b   :  { %1068 = vmatpush3.bf16.msra.mxu0 %v1190_v32  ;;  %1119 = vmatprep.subr.bf16.mxu1 %v1209_v5 }
  0x1c   :  { %1069 = vmatprep.subr.bf16.mxu0 %v1191_v39 }
  0x1e   :  { %1120 = vmatpush3.bf16.msra.mxu1 %v1209_v5 }
  0x1f   :  { %1070 = vmatpush3.bf16.msra.mxu0 %v1191_v39  ;;  %1121 = vmatprep.subr.bf16.mxu1 %v1211_v7 }
  0x20   :  { %1075 = vmatprep.subr.bf16.mxu0 %v1192_v44 }
  0x22   :  { %1072 = vmatmul.mubr.msk.bf16.vlgmr.msra.gmra.mrb[0].mxu0 %vm143_vm0, %v99_v48  ;;  %1122 = vmatpush3.bf16.msra.mxu1 %v1211_v7  ;;  %v1213_v48 = vld [vmem:[%s1524_s3 + $0x88] sm:$0xff]  }
  0x23   :  { %1076 = vmatpush3.bf16.msra.mxu0 %v1192_v44  ;;  %1083 = vmatprep.mubr.msk.bf16.mxu0 %vm143_vm0, %v295_v50  ;;  %v1218_v50 = vld [vmem:[%s1524_s3 + $0xb0] sm:$0xff]  }
  0x24   :  { %1077 = vmatprep.subr.bf16.mxu0 %v1193_v49  ;;  %1127 = vmatprep.subr.bf16.mxu1 %v1212_v9 }
  0x27   :  { %1078 = vmatpush3.bf16.msra.mxu0 %v1193_v49  ;;  %v1217_v49 = vld [vmem:[%s1524_s3 + $0xa8] sm:$0xff]  }
  0x28   :  { %1079 = vmatprep.subr.bf16.mxu0 %v1194_v52 }
  0x2b   :  { %1080 = vmatpush3.bf16.msra.mxu0 %v1194_v52  ;;  %v1220_v52 = vld [vmem:[%s1525_s5] sm:$0xff]  }
  0x2c   :  { %1081 = vmatprep.subr.bf16.mxu0 %v1195_v54 }
  0x2f   :  { %1082 = vmatpush3.bf16.msra.mxu0 %v1195_v54  ;;  %v1222_v54 = vld [vmem:[%s1525_s5 + $0x10] sm:$0xff]  }
  0x30   :  { %1087 = vmatprep.subr.bf16.mxu0 %v1196_v59 }
  0x32   :  { %1084 = vmatmul.mubr.msk.bf16.vlgmr.msra.gmra.mrb[0].mxu0 %vm143_vm0, %v296_v60 }
  0x33   :  { %1088 = vmatpush3.bf16.msra.mxu0 %v1196_v59  ;;  %v990_v59 = vld [vmem:[%s1527_s4] ss:$0 sm:$0xff] }
  0x34   :  { %1089 = vmatprep.subr.bf16.mxu0 %v1198_v61 }
  0x37   :  { %1090 = vmatpush3.bf16.msra.mxu0 %v1198_v61 }
  0x38   :  { %1091 = vmatprep.subr.bf16.mxu0 %v1200_v62 }
  0x3b   :  { %1092 = vmatpush3.bf16.msra.mxu0 %v1200_v62 }
  0x3c   :  { %1093 = vmatprep.subr.bf16.mxu0 %v1202_v63 }
  0x3f   :  { %1094 = vmatpush3.bf16.msra.mxu0 %v1202_v63 }
  0x40   :  { %1095 = vmatprep.subr.bf16.mxu0 %v1204_v0 }
  0x43   :  { %1096 = vmatpush3.bf16.msra.mxu0 %v1204_v0 }
  0x44   :  { %1097 = vmatprep.subr.bf16.mxu0 %v1206_v1 }
  0x47   :  { %1098 = vmatpush3.bf16.msra.mxu0 %v1206_v1 }
  0x48   :  { %1099 = vmatprep.subr.bf16.mxu0 %v1208_v4 }
  0x4b   :  { %1100 = vmatpush3.bf16.msra.mxu0 %v1208_v4 }
  0x4c   :  { %1101 = vmatprep.subr.bf16.mxu0 %v1210_v6 }
  0x4f   :  { %1102 = vmatpush3.bf16.msra.mxu0 %v1210_v6 }
 0x105   :  { %v1085_v11 = vpop.f32.mrb[0].mxu0 }
 0x106   :  { %v398_v12 = vadd.f32 %v1085_v11, %v921_v10  ;;  %v370_v13 = vpop.f32.mrb[1].mxu0 }
 0x107   :  { %v396_v14 = vadd.f32 %v921_v10, %v370_v13  ;;  %v1086_v16 = vpop.f32.mrb[2].mxu0 }
 0x108   :  { %v402_v17 = vmax.f32 %v398_v12, 0.0  ;;  %v399_v18 = vadd.f32 %v1086_v16, %v921_v10  ;;  %v373_v19 = vpop.f32.mrb[3].mxu0 }
 0x109   :  { %v400_v20 = vmax.f32 %v396_v14, 0.0  ;;  %v397_v22 = vadd.f32 %v921_v10, %v373_v19 }
 0x10a   :  { %v403_v23 = vmax.f32 %v399_v18, 0.0  ;;  %v406_v24 = vrot.slane %v402_v17, 7  ;;  %v649_v28 = vrot.slane %v402_v17, 1 }
 0x10b   :  { %v404_v25 = vrot.slane %v400_v20, 7  ;;  %v647_v26 = vrot.slane %v400_v20, 1  ;;  %v401_v27 = vmax.f32 %v397_v22, 0.0 }
 0x10c   :  { %v407_v29 = vrot.slane %v403_v23, 7  ;;  %v435_v30 = vpack.c.bf16 %v403_v23, %v402_v17  ;;  %v650_v31 = vrot.slane %v403_v23, 1 }
 0x10d   :  { %v405_v32 = vrot.slane %v401_v27, 7  ;;  %v648_v33 = vrot.slane %v401_v27, 1  ;;  %v434_v35 = vpack.c.bf16 %v401_v27, %v400_v20 }
 0x10e   :  { %v651_v36 = vsel %vm282_vm3, %v649_v28, %v650_v31  ;;  %v654_v38 = vsel %vm282_vm3, %v650_v31, %v647_v26  ;;  %v411_v39 = vsel %vm85_vm1, %v407_v29, %v404_v25  ;;  %v408_v40 = vsel %vm85_vm1, %v406_v24, %v407_v29 }
 0x10f   :  { %v988_v41 = vpack.c.bf16 %v654_v38, %v651_v36  ;;  %1103 = vmatprep.mubr.bf16.mxu0 %v434_v35  ;;  %v410_v42 = vsel %vm85_vm1, %v404_v25, %v405_v32  ;;  %v409_v43 = vsel %vm85_vm1, %v405_v32, %v406_v24  ;;  %v652_v44 = vsel %vm282_vm3, %v648_v33, %v649_v28 }
 0x110   :  { %1104 = vmatmul.mubr.bf16.vlgmr.msra.gmra.mrb[4].mxu0 %v435_v30  ;;  %v955_v45 = vpack.c.bf16 %v410_v42, %v411_v39  ;;  %v958_v46 = vpack.c.bf16 %v408_v40, %v409_v43  ;;  %v653_v47 = vsel %vm282_vm3, %v647_v26, %v648_v33 }
 0x111   :  { %v985_v15 = vpack.c.bf16 %v652_v44, %v653_v47 }
 0x112   :  { %1123 = vmatprep.mubr.msk.bf16.mxu1 %vm954_vm8, %v955_v45 }
 0x113   :  { %1124 = vmatmul.mubr.msk.bf16.vlgmr.msra.gmra.mrb[0].mxu1 %vm957_vm9, %v958_v46 }
 0x114   :  { %1128 = vmatpush3.bf16.msra.mxu1 %v1212_v9  ;;  %1143 = vmatprep.mubr.msk.bf16.mxu1 %vm984_vm10, %v985_v15 }
 0x115   :  { %1129 = vmatprep.subr.bf16.mxu1 %v1213_v48 }
 0x118   :  { %1130 = vmatpush3.bf16.msra.mxu1 %v1213_v48 }
 0x119   :  { %1131 = vmatprep.subr.bf16.mxu1 %v1214_v34 }
 0x11c   :  { %1132 = vmatpush3.bf16.msra.mxu1 %v1214_v34 }
 0x11d   :  { %1133 = vmatprep.subr.bf16.mxu1 %v1215_v3 }
 0x120   :  { %1134 = vmatpush3.bf16.msra.mxu1 %v1215_v3 }
 0x121   :  { %1135 = vmatprep.subr.bf16.mxu1 %v1216_v37 }
 0x124   :  { %1136 = vmatpush3.bf16.msra.mxu1 %v1216_v37 }
 0x125   :  { %1137 = vmatprep.subr.bf16.mxu1 %v1217_v49 }
 0x128   :  { %1138 = vmatpush3.bf16.msra.mxu1 %v1217_v49 }
 0x129   :  { %1139 = vmatprep.subr.bf16.mxu1 %v1218_v50 }
 0x12c   :  { %1140 = vmatpush3.bf16.msra.mxu1 %v1218_v50 }
 0x12d   :  { %1141 = vmatprep.subr.bf16.mxu1 %v1219_v51 }
 0x130   :  { %1142 = vmatpush3.bf16.msra.mxu1 %v1219_v51 }
 0x131   :  { %1147 = vmatprep.subr.bf16.mxu1 %v1220_v52 }
 0x133   :  { %1144 = vmatmul.mubr.msk.bf16.vlgmr.msra.gmra.mrb[0].mxu1 %vm987_vm11, %v988_v41 }
 0x134   :  { %1148 = vmatpush3.bf16.msra.mxu1 %v1220_v52  ;;  %1155 = vmatprep.mubr.msk.bf16.mxu1 %vm143_vm0, %v1284_v8 }
 0x135   :  { %1149 = vmatprep.subr.bf16.mxu1 %v1221_v53 }
 0x138   :  { %1150 = vmatpush3.bf16.msra.mxu1 %v1221_v53 }
 0x139   :  { %1151 = vmatprep.subr.bf16.mxu1 %v1222_v54 }
 0x13c   :  { %1152 = vmatpush3.bf16.msra.mxu1 %v1222_v54 }
 0x13d   :  { %1153 = vmatprep.subr.bf16.mxu1 %v1223_v55 }
 0x140   :  { %1154 = vmatpush3.bf16.msra.mxu1 %v1223_v55 }
 0x143   :  { %1156 = vmatmul.mubr.msk.bf16.vlgmr.msra.gmra.mrb[0].mxu1 %vm143_vm0, %v1321_v21 }
 0x1e3   :  { %v1105_v56 = vpop.f32.mrb[4].mxu0 }
 0x1e4   :  { %v535_v57 = vpop.f32.mrb[5].mxu0  ;;  %v1159_v60 = vadd.f32 %v1105_v56, %v990_v59 }
 0x1e5   :  { %v1106_v8 = vpop.f32.mrb[6].mxu0  ;;  %v1161_v61 = vadd.f32 %v990_v59, %v535_v57 }
 0x1e6   :  { %v538_v58 = vpop.f32.mrb[7].mxu0  ;;  %v1163_v63 = vadd.f32 %v1106_v8, %v990_v59 }
 0x1e7   :  { %v1165_v2 = vadd.f32 %v990_v59, %v538_v58 }
 0x216   :  { %v1157_v62 = vpop.f32.mrb[0].mxu1 }
 0x217   :  { %v1160_v0 = vadd.f32 %v1159_v60, %v1157_v62  ;;  %v856_v1 = vpop.f32.mrb[1].mxu1 }
 0x218   :  { %v1162_v4 = vadd.f32 %v1161_v61, %v856_v1  ;;  %v1158_v5 = vpop.f32.mrb[2].mxu1 }
 0x219   :  { %v877_v6 = vmax.f32 %v1160_v0, 0.0  ;;  %v1164_v7 = vadd.f32 %v1163_v63, %v1158_v5  ;;  %v859_v21 = vpop.f32.mrb[3].mxu1 }
 0x21a   :  { %v875_v9 = vmax.f32 %v1162_v4, 0.0  ;;  %v1166_v10 = vadd.f32 %v1165_v2, %v859_v21 }
 0x21b   :  { %881 = vst [vmem:[%s1528_s6 + $0x10] sm:$0xff] %v877_v6  ;;  %v878_v11 = vmax.f32 %v1164_v7, 0.0 }
 0x21c   :  { %879 = vst [vmem:[%s1528_s6] sm:$0xff] %v875_v9  ;;  %v876_v12 = vmax.f32 %v1166_v10, 0.0 }
 0x21d   :  { %882 = vst [vmem:[%s1528_s6 + $0x18] sm:$0xff] %v878_v11 }
 0x21e   :  { %880 = vst [vmem:[%s1528_s6 + $0x8] sm:$0xff] %v876_v12 }

</bundles_post_ra>
